<compile_context>
chip_gen: v7x
topology: tpu7x:2x2x1
jax: 0.10.0
libtpu: 0.0.40
codegen_flags: <defaults>
</compile_context>

<pallas_src>
import math
import functools

import numpy as np
import jax
import jax.numpy as jnp
from jax.experimental import pallas as pl
from jax.experimental.pallas import tpu as pltpu


# ----------------------------------------------------------------------------
# Pallas kernel
# ----------------------------------------------------------------------------
def ffq_kernel(x_ref, w1_ref, b1_ref, qw_ref, w2_ref, b2_ref, out_ref,
               *, n_qubits: int, pack: int):
    Q, P = n_qubits, pack
    x = x_ref[...]                                           # (R, P*E) f32
    R = x.shape[0]

    # linear_1 on P packed tokens at once (block-diagonal W1^T).
    h = jnp.dot(x, w1_ref[...], preferred_element_type=jnp.float32) + b1_ref[...]

    # --- analytic VQC (AngleEmbedding RX + 1 BasicEntanglerLayer RX + CNOT ring)
    theta = h + qw_ref[...]                                  # (R, P*Q)
    c = jnp.cos(theta)                                       # per-qubit <Z> pre-CNOT

    # z[r, s*Q + i] = prod over qubits j contributing to expectation i of token s:
    #   qubit 0   contributes to E_i for i >= 1
    #   qubit j>0 contributes to E_0 and E_i for i >= j
    lane = jax.lax.broadcasted_iota(jnp.int32, (R, Q), 1)    # expval index i per lane
    zs = []
    for s in range(P):                                       # static, P*Q tiny; VPU has slack
        cs = c[:, s * Q:(s + 1) * Q]                         # (R, Q) this token slot
        z = jnp.where(lane >= 1, cs[:, 0:1], 1.0)            # qubit-0 factor
        for j in range(1, Q):
            m = (lane >= j) | (lane == 0)
            z = z * jnp.where(m, cs[:, j:j + 1], 1.0)
        zs.append(z)
    z = zs[0] if P == 1 else jnp.concatenate(zs, axis=-1)    # (R, P*Q)

    # linear_2 on P packed tokens at once (block-diagonal W2^T).
    y = jnp.dot(z, w2_ref[...], preferred_element_type=jnp.float32) + b2_ref[...]
    out_ref[...] = y.astype(out_ref.dtype)                   # full 128-lane store


# ----------------------------------------------------------------------------
# Wrapper: flatten (B, S) -> rows, pack P tokens per 128-lane row, row-tile.
# ----------------------------------------------------------------------------
def _round_up(x: int, m: int) -> int:
    return ((x + m - 1) // m) * m


def feed_forward_quantum(x, w1_t, b1, qweights, w2_t, b2, *, rows_per_tile=512):
    """Fused FeedForwardQuantum forward.

    x:        (B, S, E)
    w1_t:     (E, Q)   pre-transposed nn.Linear(embed_dim, n_qubits).weight
    b1:       (Q,)
    qweights: (1, Q)   BasicEntanglerLayers weights (single layer)
    w2_t:     (Q, E)   pre-transposed nn.Linear(n_qubits, embed_dim).weight
    b2:       (E,)
    returns:  (B, S, E)
    """
    B, S, E = x.shape
    Ew, Q = w1_t.shape
    assert Ew == E
    assert qweights.shape == (1, Q), "closed-form VQC implemented for n_qlayers == 1"
    assert Q >= 3, "CNOT-ring closed form needs n_qubits >= 3"

    # ---- token packing factor: P tokens per 128-lane row (lane-dense IO) ----
    P = (128 // E) if (E < 128 and 128 % E == 0) else 1
    EP, PQ = P * E, P * Q

    # ---- row tiling: big tiles, bounded by a conservative VMEM budget ----
    N = B * S
    M_raw = -(-N // P)                       # packed rows needed
    VMEM_BUDGET = 24 * 1024 * 1024           # double-buffered in+out tiles (all gens)
    bytes_per_row = 2 * 2 * EP * 4           # (in + out) * double-buffer * f32
    R = rows_per_tile
    while R > 8 and R * bytes_per_row > VMEM_BUDGET:
        R //= 2
    R = _round_up(max(8, min(R, _round_up(M_raw, 8))), 8)
    M_pad = _round_up(M_raw, R)
    grid = (M_pad // R,)

    # ---- pack x: (B, S, E) -> (M_pad, P*E), zero-pad the tail rows ----
    x_flat = x.reshape(N, E)
    pad = M_pad * P - N
    if pad:
        x_flat = jnp.concatenate([x_flat, jnp.zeros((pad, E), x.dtype)], axis=0)
    x_pack = x_flat.reshape(M_pad, EP)

    # ---- pack weights (block-diagonal) & tile biases / VQC angles ----
    # Done once outside the hot path in practice; exact zeros off-diagonal.
    eye_p = jnp.eye(P, dtype=w1_t.dtype)
    w1_pack = jnp.kron(eye_p, w1_t)                        # (P*E, P*Q)
    w2_pack = jnp.kron(eye_p, w2_t)                        # (P*Q, P*E)
    b1_pack = jnp.tile(b1.reshape(1, Q), (1, P))           # (1, P*Q)
    qw_pack = jnp.tile(qweights.reshape(1, Q), (1, P))     # (1, P*Q)
    b2_pack = jnp.tile(b2.reshape(1, E), (1, P))           # (1, P*E)

    kernel = functools.partial(ffq_kernel, n_qubits=Q, pack=P)

    out_pack = pl.pallas_call(
        kernel,
        out_shape=jax.ShapeDtypeStruct((M_pad, EP), x.dtype),
        grid_spec=pl.GridSpec(
            grid=grid,
            in_specs=[
                pl.BlockSpec((R, EP), lambda i: (i, 0)),    # x row tile
                pl.BlockSpec((EP, PQ), lambda i: (0, 0)),   # W1 packed (resident)
                pl.BlockSpec((1, PQ), lambda i: (0, 0)),    # b1 packed
                pl.BlockSpec((1, PQ), lambda i: (0, 0)),    # VQC angles packed
                pl.BlockSpec((PQ, EP), lambda i: (0, 0)),   # W2 packed (resident)
                pl.BlockSpec((1, EP), lambda i: (0, 0)),    # b2 packed
            ],
            out_specs=pl.BlockSpec((R, EP), lambda i: (i, 0)),
        ),
        compiler_params=pltpu.CompilerParams(
            dimension_semantics=("parallel",),
            # 24 MiB tile budget + tiny weights + compiler scratch headroom;
            # safe on v5e/v6e (128 MiB physical) and v7x (64 MiB physical).
            vmem_limit_bytes=48 * 1024 * 1024,
        ),
    )(x_pack, w1_pack, b1_pack, qw_pack, w2_pack, b2_pack)

    out = out_pack.reshape(M_pad * P, E)[:N]
    return out.reshape(B, S, E)


# ----------------------------------------------------------------------------
# Exact statevector reference (numpy, float64) mirroring the PennyLane circuit
# ----------------------------------------------------------------------------
def _rx(theta):
    c, s = np.cos(theta / 2.0), np.sin(theta / 2.0)
    return np.array([[c, -1j * s], [-1j * s, c]], dtype=np.complex128)


def _apply_1q(state, gate, wire):
    state = np.tensordot(gate, state, axes=([1], [wire]))
    return np.moveaxis(state, 0, wire)


def _apply_cnot(state, control, target):
    n = state.ndim
    st = state.copy()
    idx = [slice(None)] * n
    idx[control] = 1
    t_ax = target if target < control else target - 1
    st[tuple(idx)] = np.flip(st[tuple(idx)], axis=t_ax).copy()
    return st


def _vqc_token_ref(angles, qweights):
    n = angles.shape[0]
    state = np.zeros((2,) * n, dtype=np.complex128)
    state[(0,) * n] = 1.0
    for i in range(n):                               # AngleEmbedding (RX)
        state = _apply_1q(state, _rx(angles[i]), i)
    for layer in qweights:                           # BasicEntanglerLayers
        for i in range(n):
            state = _apply_1q(state, _rx(layer[i]), i)
        pairs = [(0, 1)] if n == 2 else [(i, (i + 1) % n) for i in range(n)]
        for ctrl, tgt in pairs:
            state = _apply_cnot(state, ctrl, tgt)
    probs = np.abs(state) ** 2
    out = np.zeros(n)
    for i in range(n):
        sign = np.ones((2,) * n)
        idx = [slice(None)] * n
        idx[i] = 1
        sign[tuple(idx)] = -1.0
        out[i] = np.sum(probs * sign)
    return out


def _reference(x, w1, b1, qweights, w2, b2):
    x = np.asarray(x, np.float64)
    w1 = np.asarray(w1, np.float64); b1 = np.asarray(b1, np.float64)
    w2 = np.asarray(w2, np.float64); b2 = np.asarray(b2, np.float64)
    qw = np.asarray(qweights, np.float64)
    h = x @ w1.T + b1                                # (B, S, Q)
    B, S, Q = h.shape
    z = np.zeros((B, S, Q))
    for b in range(B):
        for t in range(S):
            z[b, t] = _vqc_token_ref(h[b, t], qw)
    return z @ w2.T + b2                             # (B, S, E)


# ----------------------------------------------------------------------------
if __name__ == "__main__":
    B, S, E, Q, L = 2, 8, 32, 4, 1                   # batch, seq, embed_dim, n_qubits, n_qlayers

    key = jax.random.PRNGKey(0)
    kx, k1, kb1, kq, k2, kb2 = jax.random.split(key, 6)

    x = jax.random.normal(kx, (B, S, E), dtype=jnp.float32)
    bound1 = 1.0 / math.sqrt(E)
    w1 = jax.random.uniform(k1, (Q, E), jnp.float32, -bound1, bound1)   # linear_1.weight
    b1 = jax.random.uniform(kb1, (Q,), jnp.float32, -bound1, bound1)    # linear_1.bias
    qweights = jax.random.uniform(kq, (L, Q), jnp.float32, 0.0, 2.0 * math.pi)
    bound2 = 1.0 / math.sqrt(Q)
    w2 = jax.random.uniform(k2, (E, Q), jnp.float32, -bound2, bound2)   # linear_2.weight
    b2 = jax.random.uniform(kb2, (E,), jnp.float32, -bound2, bound2)    # linear_2.bias

    # Transpose once outside the call path (no per-call W.T).
    w1_t = jnp.asarray(w1.T)   # (E, Q)
    w2_t = jnp.asarray(w2.T)   # (Q, E)

    out = feed_forward_quantum(x, w1_t, b1, qweights, w2_t, b2)
    out = jax.block_until_ready(out)

    ref = _reference(x, w1, b1, qweights, w2, b2)
    assert out.shape == (B, S, E)
    assert np.allclose(np.asarray(out), ref, atol=1e-4, rtol=1e-4), \
        "mismatch vs statevector reference"

    print("KERNEL_OK")
</pallas_src>

<mosaic_0001>
module attributes {stable_mosaic.version = 11 : i64} {
  func.func @ffq_kernel(%arg0: i32, %arg1: memref<8x128xf32, #tpu.memory_space<vmem>>, %arg2: memref<128x16xf32, #tpu.memory_space<vmem>>, %arg3: memref<1x16xf32, #tpu.memory_space<vmem>>, %arg4: memref<1x16xf32, #tpu.memory_space<vmem>>, %arg5: memref<16x128xf32, #tpu.memory_space<vmem>>, %arg6: memref<1x128xf32, #tpu.memory_space<vmem>>, %arg7: memref<8x128xf32, #tpu.memory_space<vmem>>) attributes {dimension_semantics = [#tpu.dimension_semantics<parallel>], iteration_bounds = array<i64: 1>, scalar_prefetch = 0 : i64, scratch_operands = 0 : i64, tpu.core_type = #tpu.core_type<tc>, window_params = [{transform_indices = @transform_0, window_bounds = array<i64: 8, 128>}, {pipeline_mode = #tpu.pipeline_mode<synchronous>, transform_indices = @transform_1, window_bounds = array<i64: 128, 16>}, {pipeline_mode = #tpu.pipeline_mode<synchronous>, transform_indices = @transform_2, window_bounds = array<i64: 1, 16>}, {pipeline_mode = #tpu.pipeline_mode<synchronous>, transform_indices = @transform_3, window_bounds = array<i64: 1, 16>}, {pipeline_mode = #tpu.pipeline_mode<synchronous>, transform_indices = @transform_4, window_bounds = array<i64: 16, 128>}, {pipeline_mode = #tpu.pipeline_mode<synchronous>, transform_indices = @transform_5, window_bounds = array<i64: 1, 128>}, {transform_indices = @transform_6, window_bounds = array<i64: 8, 128>}]} {
    %c0 = arith.constant 0 : index
    %c0_0 = arith.constant 0 : index
    %0 = vector.load %arg1[%c0, %c0_0] : memref<8x128xf32, #tpu.memory_space<vmem>>, vector<8x128xf32>
    %c0_1 = arith.constant 0 : index
    %c0_2 = arith.constant 0 : index
    %1 = vector.load %arg2[%c0_1, %c0_2] : memref<128x16xf32, #tpu.memory_space<vmem>>, vector<128x16xf32>
    %cst = arith.constant dense<0.000000e+00> : vector<8x16xf32>
    %2 = tpu.matmul %0, %1, %cst {dimension_numbers = #tpu.dot_dimension_numbers<[1], [0], [0], [1], [0, 0, 1, 1], [], []>} : vector<8x128xf32>, vector<128x16xf32>, vector<8x16xf32> -> vector<8x16xf32>
    %c0_3 = arith.constant 0 : index
    %c0_4 = arith.constant 0 : index
    %3 = vector.load %arg3[%c0_3, %c0_4] : memref<1x16xf32, #tpu.memory_space<vmem>>, vector<1x16xf32>
    %4 = vector.broadcast %3 : vector<1x16xf32> to vector<8x16xf32>
    %5 = arith.addf %2, %4 : vector<8x16xf32>
    %c0_5 = arith.constant 0 : index
    %c0_6 = arith.constant 0 : index
    %6 = vector.load %arg4[%c0_5, %c0_6] : memref<1x16xf32, #tpu.memory_space<vmem>>, vector<1x16xf32>
    %7 = vector.broadcast %6 : vector<1x16xf32> to vector<8x16xf32>
    %8 = arith.addf %5, %7 : vector<8x16xf32>
    %9 = math.cos %8 : vector<8x16xf32>
    %10 = tpu.iota {dimensions = array<i32: 1>} : vector<8x4xi32>
    %11 = vector.extract_strided_slice %9 {offsets = [0, 0], sizes = [8, 4], strides = [1, 1]} : vector<8x16xf32> to vector<8x4xf32>
    %c1_i32 = arith.constant 1 : i32
    %12 = vector.broadcast %c1_i32 : i32 to vector<8x4xi32>
    %13 = arith.cmpi sge, %10, %12 : vector<8x4xi32>
    %14 = vector.extract_strided_slice %11 {offsets = [0, 0], sizes = [8, 1], strides = [1, 1]} : vector<8x4xf32> to vector<8x1xf32>
    %cst_7 = arith.constant 1.000000e+00 : f32
    %15 = vector.shape_cast %14 : vector<8x1xf32> to vector<8x1xf32>
    %16 = vector.broadcast %15 : vector<8x1xf32> to vector<8x4xf32>
    %17 = vector.broadcast %cst_7 : f32 to vector<8x4xf32>
    %18 = arith.select %13, %16, %17 : vector<8x4xi1>, vector<8x4xf32>
    %c1_i32_8 = arith.constant 1 : i32
    %19 = vector.broadcast %c1_i32_8 : i32 to vector<8x4xi32>
    %20 = arith.cmpi sge, %10, %19 : vector<8x4xi32>
    %c0_i32 = arith.constant 0 : i32
    %21 = vector.broadcast %c0_i32 : i32 to vector<8x4xi32>
    %22 = arith.cmpi eq, %10, %21 : vector<8x4xi32>
    %23 = arith.ori %20, %22 : vector<8x4xi1>
    %24 = vector.extract_strided_slice %11 {offsets = [0, 1], sizes = [8, 1], strides = [1, 1]} : vector<8x4xf32> to vector<8x1xf32>
    %cst_9 = arith.constant 1.000000e+00 : f32
    %25 = vector.shape_cast %24 : vector<8x1xf32> to vector<8x1xf32>
    %26 = vector.broadcast %25 : vector<8x1xf32> to vector<8x4xf32>
    %27 = vector.broadcast %cst_9 : f32 to vector<8x4xf32>
    %28 = arith.select %23, %26, %27 : vector<8x4xi1>, vector<8x4xf32>
    %29 = arith.mulf %18, %28 : vector<8x4xf32>
    %c2_i32 = arith.constant 2 : i32
    %30 = vector.broadcast %c2_i32 : i32 to vector<8x4xi32>
    %31 = arith.cmpi sge, %10, %30 : vector<8x4xi32>
    %c0_i32_10 = arith.constant 0 : i32
    %32 = vector.broadcast %c0_i32_10 : i32 to vector<8x4xi32>
    %33 = arith.cmpi eq, %10, %32 : vector<8x4xi32>
    %34 = arith.ori %31, %33 : vector<8x4xi1>
    %35 = vector.extract_strided_slice %11 {offsets = [0, 2], sizes = [8, 1], strides = [1, 1]} : vector<8x4xf32> to vector<8x1xf32>
    %cst_11 = arith.constant 1.000000e+00 : f32
    %36 = vector.shape_cast %35 : vector<8x1xf32> to vector<8x1xf32>
    %37 = vector.broadcast %36 : vector<8x1xf32> to vector<8x4xf32>
    %38 = vector.broadcast %cst_11 : f32 to vector<8x4xf32>
    %39 = arith.select %34, %37, %38 : vector<8x4xi1>, vector<8x4xf32>
    %40 = arith.mulf %29, %39 : vector<8x4xf32>
    %c3_i32 = arith.constant 3 : i32
    %41 = vector.broadcast %c3_i32 : i32 to vector<8x4xi32>
    %42 = arith.cmpi sge, %10, %41 : vector<8x4xi32>
    %c0_i32_12 = arith.constant 0 : i32
    %43 = vector.broadcast %c0_i32_12 : i32 to vector<8x4xi32>
    %44 = arith.cmpi eq, %10, %43 : vector<8x4xi32>
    %45 = arith.ori %42, %44 : vector<8x4xi1>
    %46 = vector.extract_strided_slice %11 {offsets = [0, 3], sizes = [8, 1], strides = [1, 1]} : vector<8x4xf32> to vector<8x1xf32>
    %cst_13 = arith.constant 1.000000e+00 : f32
    %47 = vector.shape_cast %46 : vector<8x1xf32> to vector<8x1xf32>
    %48 = vector.broadcast %47 : vector<8x1xf32> to vector<8x4xf32>
    %49 = vector.broadcast %cst_13 : f32 to vector<8x4xf32>
    %50 = arith.select %45, %48, %49 : vector<8x4xi1>, vector<8x4xf32>
    %51 = arith.mulf %40, %50 : vector<8x4xf32>
    %52 = vector.extract_strided_slice %9 {offsets = [0, 4], sizes = [8, 4], strides = [1, 1]} : vector<8x16xf32> to vector<8x4xf32>
    %c1_i32_14 = arith.constant 1 : i32
    %53 = vector.broadcast %c1_i32_14 : i32 to vector<8x4xi32>
    %54 = arith.cmpi sge, %10, %53 : vector<8x4xi32>
    %55 = vector.extract_strided_slice %52 {offsets = [0, 0], sizes = [8, 1], strides = [1, 1]} : vector<8x4xf32> to vector<8x1xf32>
    %cst_15 = arith.constant 1.000000e+00 : f32
    %56 = vector.shape_cast %55 : vector<8x1xf32> to vector<8x1xf32>
    %57 = vector.broadcast %56 : vector<8x1xf32> to vector<8x4xf32>
    %58 = vector.broadcast %cst_15 : f32 to vector<8x4xf32>
    %59 = arith.select %54, %57, %58 : vector<8x4xi1>, vector<8x4xf32>
    %c1_i32_16 = arith.constant 1 : i32
    %60 = vector.broadcast %c1_i32_16 : i32 to vector<8x4xi32>
    %61 = arith.cmpi sge, %10, %60 : vector<8x4xi32>
    %c0_i32_17 = arith.constant 0 : i32
    %62 = vector.broadcast %c0_i32_17 : i32 to vector<8x4xi32>
    %63 = arith.cmpi eq, %10, %62 : vector<8x4xi32>
    %64 = arith.ori %61, %63 : vector<8x4xi1>
    %65 = vector.extract_strided_slice %52 {offsets = [0, 1], sizes = [8, 1], strides = [1, 1]} : vector<8x4xf32> to vector<8x1xf32>
    %cst_18 = arith.constant 1.000000e+00 : f32
    %66 = vector.shape_cast %65 : vector<8x1xf32> to vector<8x1xf32>
    %67 = vector.broadcast %66 : vector<8x1xf32> to vector<8x4xf32>
    %68 = vector.broadcast %cst_18 : f32 to vector<8x4xf32>
    %69 = arith.select %64, %67, %68 : vector<8x4xi1>, vector<8x4xf32>
    %70 = arith.mulf %59, %69 : vector<8x4xf32>
    %c2_i32_19 = arith.constant 2 : i32
    %71 = vector.broadcast %c2_i32_19 : i32 to vector<8x4xi32>
    %72 = arith.cmpi sge, %10, %71 : vector<8x4xi32>
    %c0_i32_20 = arith.constant 0 : i32
    %73 = vector.broadcast %c0_i32_20 : i32 to vector<8x4xi32>
    %74 = arith.cmpi eq, %10, %73 : vector<8x4xi32>
    %75 = arith.ori %72, %74 : vector<8x4xi1>
    %76 = vector.extract_strided_slice %52 {offsets = [0, 2], sizes = [8, 1], strides = [1, 1]} : vector<8x4xf32> to vector<8x1xf32>
    %cst_21 = arith.constant 1.000000e+00 : f32
    %77 = vector.shape_cast %76 : vector<8x1xf32> to vector<8x1xf32>
    %78 = vector.broadcast %77 : vector<8x1xf32> to vector<8x4xf32>
    %79 = vector.broadcast %cst_21 : f32 to vector<8x4xf32>
    %80 = arith.select %75, %78, %79 : vector<8x4xi1>, vector<8x4xf32>
    %81 = arith.mulf %70, %80 : vector<8x4xf32>
    %c3_i32_22 = arith.constant 3 : i32
    %82 = vector.broadcast %c3_i32_22 : i32 to vector<8x4xi32>
    %83 = arith.cmpi sge, %10, %82 : vector<8x4xi32>
    %c0_i32_23 = arith.constant 0 : i32
    %84 = vector.broadcast %c0_i32_23 : i32 to vector<8x4xi32>
    %85 = arith.cmpi eq, %10, %84 : vector<8x4xi32>
    %86 = arith.ori %83, %85 : vector<8x4xi1>
    %87 = vector.extract_strided_slice %52 {offsets = [0, 3], sizes = [8, 1], strides = [1, 1]} : vector<8x4xf32> to vector<8x1xf32>
    %cst_24 = arith.constant 1.000000e+00 : f32
    %88 = vector.shape_cast %87 : vector<8x1xf32> to vector<8x1xf32>
    %89 = vector.broadcast %88 : vector<8x1xf32> to vector<8x4xf32>
    %90 = vector.broadcast %cst_24 : f32 to vector<8x4xf32>
    %91 = arith.select %86, %89, %90 : vector<8x4xi1>, vector<8x4xf32>
    %92 = arith.mulf %81, %91 : vector<8x4xf32>
    %93 = vector.extract_strided_slice %9 {offsets = [0, 8], sizes = [8, 4], strides = [1, 1]} : vector<8x16xf32> to vector<8x4xf32>
    %c1_i32_25 = arith.constant 1 : i32
    %94 = vector.broadcast %c1_i32_25 : i32 to vector<8x4xi32>
    %95 = arith.cmpi sge, %10, %94 : vector<8x4xi32>
    %96 = vector.extract_strided_slice %93 {offsets = [0, 0], sizes = [8, 1], strides = [1, 1]} : vector<8x4xf32> to vector<8x1xf32>
    %cst_26 = arith.constant 1.000000e+00 : f32
    %97 = vector.shape_cast %96 : vector<8x1xf32> to vector<8x1xf32>
    %98 = vector.broadcast %97 : vector<8x1xf32> to vector<8x4xf32>
    %99 = vector.broadcast %cst_26 : f32 to vector<8x4xf32>
    %100 = arith.select %95, %98, %99 : vector<8x4xi1>, vector<8x4xf32>
    %c1_i32_27 = arith.constant 1 : i32
    %101 = vector.broadcast %c1_i32_27 : i32 to vector<8x4xi32>
    %102 = arith.cmpi sge, %10, %101 : vector<8x4xi32>
    %c0_i32_28 = arith.constant 0 : i32
    %103 = vector.broadcast %c0_i32_28 : i32 to vector<8x4xi32>
    %104 = arith.cmpi eq, %10, %103 : vector<8x4xi32>
    %105 = arith.ori %102, %104 : vector<8x4xi1>
    %106 = vector.extract_strided_slice %93 {offsets = [0, 1], sizes = [8, 1], strides = [1, 1]} : vector<8x4xf32> to vector<8x1xf32>
    %cst_29 = arith.constant 1.000000e+00 : f32
    %107 = vector.shape_cast %106 : vector<8x1xf32> to vector<8x1xf32>
    %108 = vector.broadcast %107 : vector<8x1xf32> to vector<8x4xf32>
    %109 = vector.broadcast %cst_29 : f32 to vector<8x4xf32>
    %110 = arith.select %105, %108, %109 : vector<8x4xi1>, vector<8x4xf32>
    %111 = arith.mulf %100, %110 : vector<8x4xf32>
    %c2_i32_30 = arith.constant 2 : i32
    %112 = vector.broadcast %c2_i32_30 : i32 to vector<8x4xi32>
    %113 = arith.cmpi sge, %10, %112 : vector<8x4xi32>
    %c0_i32_31 = arith.constant 0 : i32
    %114 = vector.broadcast %c0_i32_31 : i32 to vector<8x4xi32>
    %115 = arith.cmpi eq, %10, %114 : vector<8x4xi32>
    %116 = arith.ori %113, %115 : vector<8x4xi1>
    %117 = vector.extract_strided_slice %93 {offsets = [0, 2], sizes = [8, 1], strides = [1, 1]} : vector<8x4xf32> to vector<8x1xf32>
    %cst_32 = arith.constant 1.000000e+00 : f32
    %118 = vector.shape_cast %117 : vector<8x1xf32> to vector<8x1xf32>
    %119 = vector.broadcast %118 : vector<8x1xf32> to vector<8x4xf32>
    %120 = vector.broadcast %cst_32 : f32 to vector<8x4xf32>
    %121 = arith.select %116, %119, %120 : vector<8x4xi1>, vector<8x4xf32>
    %122 = arith.mulf %111, %121 : vector<8x4xf32>
    %c3_i32_33 = arith.constant 3 : i32
    %123 = vector.broadcast %c3_i32_33 : i32 to vector<8x4xi32>
    %124 = arith.cmpi sge, %10, %123 : vector<8x4xi32>
    %c0_i32_34 = arith.constant 0 : i32
    %125 = vector.broadcast %c0_i32_34 : i32 to vector<8x4xi32>
    %126 = arith.cmpi eq, %10, %125 : vector<8x4xi32>
    %127 = arith.ori %124, %126 : vector<8x4xi1>
    %128 = vector.extract_strided_slice %93 {offsets = [0, 3], sizes = [8, 1], strides = [1, 1]} : vector<8x4xf32> to vector<8x1xf32>
    %cst_35 = arith.constant 1.000000e+00 : f32
    %129 = vector.shape_cast %128 : vector<8x1xf32> to vector<8x1xf32>
    %130 = vector.broadcast %129 : vector<8x1xf32> to vector<8x4xf32>
    %131 = vector.broadcast %cst_35 : f32 to vector<8x4xf32>
    %132 = arith.select %127, %130, %131 : vector<8x4xi1>, vector<8x4xf32>
    %133 = arith.mulf %122, %132 : vector<8x4xf32>
    %134 = vector.extract_strided_slice %9 {offsets = [0, 12], sizes = [8, 4], strides = [1, 1]} : vector<8x16xf32> to vector<8x4xf32>
    %c1_i32_36 = arith.constant 1 : i32
    %135 = vector.broadcast %c1_i32_36 : i32 to vector<8x4xi32>
    %136 = arith.cmpi sge, %10, %135 : vector<8x4xi32>
    %137 = vector.extract_strided_slice %134 {offsets = [0, 0], sizes = [8, 1], strides = [1, 1]} : vector<8x4xf32> to vector<8x1xf32>
    %cst_37 = arith.constant 1.000000e+00 : f32
    %138 = vector.shape_cast %137 : vector<8x1xf32> to vector<8x1xf32>
    %139 = vector.broadcast %138 : vector<8x1xf32> to vector<8x4xf32>
    %140 = vector.broadcast %cst_37 : f32 to vector<8x4xf32>
    %141 = arith.select %136, %139, %140 : vector<8x4xi1>, vector<8x4xf32>
    %c1_i32_38 = arith.constant 1 : i32
    %142 = vector.broadcast %c1_i32_38 : i32 to vector<8x4xi32>
    %143 = arith.cmpi sge, %10, %142 : vector<8x4xi32>
    %c0_i32_39 = arith.constant 0 : i32
    %144 = vector.broadcast %c0_i32_39 : i32 to vector<8x4xi32>
    %145 = arith.cmpi eq, %10, %144 : vector<8x4xi32>
    %146 = arith.ori %143, %145 : vector<8x4xi1>
    %147 = vector.extract_strided_slice %134 {offsets = [0, 1], sizes = [8, 1], strides = [1, 1]} : vector<8x4xf32> to vector<8x1xf32>
    %cst_40 = arith.constant 1.000000e+00 : f32
    %148 = vector.shape_cast %147 : vector<8x1xf32> to vector<8x1xf32>
    %149 = vector.broadcast %148 : vector<8x1xf32> to vector<8x4xf32>
    %150 = vector.broadcast %cst_40 : f32 to vector<8x4xf32>
    %151 = arith.select %146, %149, %150 : vector<8x4xi1>, vector<8x4xf32>
    %152 = arith.mulf %141, %151 : vector<8x4xf32>
    %c2_i32_41 = arith.constant 2 : i32
    %153 = vector.broadcast %c2_i32_41 : i32 to vector<8x4xi32>
    %154 = arith.cmpi sge, %10, %153 : vector<8x4xi32>
    %c0_i32_42 = arith.constant 0 : i32
    %155 = vector.broadcast %c0_i32_42 : i32 to vector<8x4xi32>
    %156 = arith.cmpi eq, %10, %155 : vector<8x4xi32>
    %157 = arith.ori %154, %156 : vector<8x4xi1>
    %158 = vector.extract_strided_slice %134 {offsets = [0, 2], sizes = [8, 1], strides = [1, 1]} : vector<8x4xf32> to vector<8x1xf32>
    %cst_43 = arith.constant 1.000000e+00 : f32
    %159 = vector.shape_cast %158 : vector<8x1xf32> to vector<8x1xf32>
    %160 = vector.broadcast %159 : vector<8x1xf32> to vector<8x4xf32>
    %161 = vector.broadcast %cst_43 : f32 to vector<8x4xf32>
    %162 = arith.select %157, %160, %161 : vector<8x4xi1>, vector<8x4xf32>
    %163 = arith.mulf %152, %162 : vector<8x4xf32>
    %c3_i32_44 = arith.constant 3 : i32
    %164 = vector.broadcast %c3_i32_44 : i32 to vector<8x4xi32>
    %165 = arith.cmpi sge, %10, %164 : vector<8x4xi32>
    %c0_i32_45 = arith.constant 0 : i32
    %166 = vector.broadcast %c0_i32_45 : i32 to vector<8x4xi32>
    %167 = arith.cmpi eq, %10, %166 : vector<8x4xi32>
    %168 = arith.ori %165, %167 : vector<8x4xi1>
    %169 = vector.extract_strided_slice %134 {offsets = [0, 3], sizes = [8, 1], strides = [1, 1]} : vector<8x4xf32> to vector<8x1xf32>
    %cst_46 = arith.constant 1.000000e+00 : f32
    %170 = vector.shape_cast %169 : vector<8x1xf32> to vector<8x1xf32>
    %171 = vector.broadcast %170 : vector<8x1xf32> to vector<8x4xf32>
    %172 = vector.broadcast %cst_46 : f32 to vector<8x4xf32>
    %173 = arith.select %168, %171, %172 : vector<8x4xi1>, vector<8x4xf32>
    %174 = arith.mulf %163, %173 : vector<8x4xf32>
    %175 = tpu.concatenate %51, %92, %133, %174 in 1 : vector<8x4xf32>, vector<8x4xf32>, vector<8x4xf32>, vector<8x4xf32> -> vector<8x16xf32>
    %c0_47 = arith.constant 0 : index
    %c0_48 = arith.constant 0 : index
    %176 = vector.load %arg5[%c0_47, %c0_48] : memref<16x128xf32, #tpu.memory_space<vmem>>, vector<16x128xf32>
    %cst_49 = arith.constant dense<0.000000e+00> : vector<8x128xf32>
    %177 = tpu.matmul %175, %176, %cst_49 {dimension_numbers = #tpu.dot_dimension_numbers<[1], [0], [0], [1], [0, 0, 1, 1], [], []>} : vector<8x16xf32>, vector<16x128xf32>, vector<8x128xf32> -> vector<8x128xf32>
    %c0_50 = arith.constant 0 : index
    %c0_51 = arith.constant 0 : index
    %178 = vector.load %arg6[%c0_50, %c0_51] : memref<1x128xf32, #tpu.memory_space<vmem>>, vector<1x128xf32>
    %179 = vector.broadcast %178 : vector<1x128xf32> to vector<8x128xf32>
    %180 = arith.addf %177, %179 : vector<8x128xf32>
    %c0_52 = arith.constant 0 : index
    %c0_53 = arith.constant 0 : index
    %181 = vector.load %arg7[%c0_52, %c0_53] : memref<8x128xf32, #tpu.memory_space<vmem>>, vector<8x128xf32>
    tpu.vector_store %arg7[%c0_52, %c0_53], %180 {strides = array<i32>} : memref<8x128xf32, #tpu.memory_space<vmem>>, vector<8x128xf32>,
    return
  }
  func.func @transform_0(%arg0: i32) -> (i32, i32) {
    %c0_i32 = arith.constant 0 : i32
    %c0_i32_0 = arith.constant 0 : i32
    return %arg0, %c0_i32 : i32, i32
  }
  func.func @transform_1(%arg0: i32) -> (i32, i32) {
    %c0_i32 = arith.constant 0 : i32
    %c0_i32_0 = arith.constant 0 : i32
    %c0_i32_1 = arith.constant 0 : i32
    return %c0_i32, %c0_i32_0 : i32, i32
  }
  func.func @transform_2(%arg0: i32) -> (i32, i32) {
    %c0_i32 = arith.constant 0 : i32
    %c0_i32_0 = arith.constant 0 : i32
    %c0_i32_1 = arith.constant 0 : i32
    return %c0_i32, %c0_i32_0 : i32, i32
  }
  func.func @transform_3(%arg0: i32) -> (i32, i32) {
    %c0_i32 = arith.constant 0 : i32
    %c0_i32_0 = arith.constant 0 : i32
    %c0_i32_1 = arith.constant 0 : i32
    return %c0_i32, %c0_i32_0 : i32, i32
  }
  func.func @transform_4(%arg0: i32) -> (i32, i32) {
    %c0_i32 = arith.constant 0 : i32
    %c0_i32_0 = arith.constant 0 : i32
    %c0_i32_1 = arith.constant 0 : i32
    return %c0_i32, %c0_i32_0 : i32, i32
  }
  func.func @transform_5(%arg0: i32) -> (i32, i32) {
    %c0_i32 = arith.constant 0 : i32
    %c0_i32_0 = arith.constant 0 : i32
    %c0_i32_1 = arith.constant 0 : i32
    return %c0_i32, %c0_i32_0 : i32, i32
  }
  func.func @transform_6(%arg0: i32) -> (i32, i32) {
    %c0_i32 = arith.constant 0 : i32
    %c0_i32_0 = arith.constant 0 : i32
    return %arg0, %c0_i32 : i32, i32
  }
}

</mosaic_0001>

<bundles_post_ra>
// kernel: tpu_custom_call.1
= control target key start
LH: loop header
LB: loop body
LE: loop exit
PB: predicated region body
PF: predicated region fallthrough
CT: control target
= control target key end

     0   :  { %v622_v3 = vmov 0.0|0.0   ;;  %vm623_vm0 = vmmov 0   ;;  %v624_v6 = vmov 0.0   ;;  %s826_s0 = inlined_call_operand.vmem [shape: f32[8,128], index: 0, kind: input, shape index: {}]   ;;  %s827_s1 = inlined_call_operand.vmem [shape: f32[128,16], index: 1, kind: input, shape index: {}]   ;;  %s828_s2 = inlined_call_operand.vmem [shape: f32[1,16], index: 2, kind: input, shape index: {}]   ;;  %s829_s3 = inlined_call_operand.vmem [shape: f32[1,16], index: 3, kind: input, shape index: {}]   ;;  %s830_s4 = inlined_call_operand.vmem [shape: f32[16,128], index: 4, kind: input, shape index: {}]   ;;  %s831_s5 = inlined_call_operand.vmem [shape: f32[1,128], index: 5, kind: input, shape index: {}]   ;;  %s832_s6 = inlined_call_operand.hbm [shape: f32[8,128], index: 6, kind: output, shape index: {}]  }
   0x1   :  { %v25_v0 = vld [vmem:[%s827_s1] sm:$0xff]  ;;  %v26_v1 = vld [vmem:[%s827_s1 + $0x8] sm:$0xff]  ;;  %v27_v2 = vld [vmem:[%s827_s1 + $0x10] sm:$0xff]  ;;  %517 = vmatprep.subr.bf16.mxu0 %v622_v3  ;;  %507 = vmatprep.mubr.msk.f32.mxu0 %vm623_vm0, %v624_v6 }
   0x2   :  { %v518_v4 = vpack.c.bf16 %v26_v1, %v25_v0  ;;  %v28_v5 = vld [vmem:[%s827_s1 + $0x18] sm:$0xff]  ;;  %541 = vmatprep.subr.bf16.mxu1 %v622_v3  ;;  %514 = vmatprep.mubr.msk.f32.mxu1 %vm623_vm0, %v624_v6  ;;  %v29_v8 = vld [vmem:[%s827_s1 + $0x20] sm:$0xff]  ;;  %v30_v9 = vld [vmem:[%s827_s1 + $0x28] sm:$0xff] }
   0x3   :  { %v521_v7 = vpack.c.bf16 %v28_v5, %v27_v2 }
   0x4   :  { %519 = vmatpush3.bf16.msra.mxu0 %v518_v4 }
   0x5   :  { %520 = vmatprep.subr.bf16.mxu0 %v622_v3 }
   0x6   :  { %11 = vsyncpa [#allocation3], 0  ;;  %v524_v10 = vpack.c.bf16 %v30_v9, %v29_v8  ;;  %v31_v11 = vld [vmem:[%s827_s1 + $0x30] sm:$0xff]  ;;  %v32_v12 = vld [vmem:[%s827_s1 + $0x38] sm:$0xff]  ;;  %v625_v27 = vmov 8   ;;  %v626_v28 = vmov 4  }
   0x7   :  { %v527_v13 = vpack.c.bf16 %v32_v12, %v31_v11  ;;  %v33_v14 = vld [vmem:[%s827_s1 + $0x40] sm:$0xff]  ;;  %v34_v15 = vld [vmem:[%s827_s1 + $0x48] sm:$0xff]  ;;  %v35_v17 = vld [vmem:[%s827_s1 + $0x50] sm:$0xff]  ;;  %579 = vset.pattern.permute.xlu1 %v625_v27  ;;  %577 = vset.pattern.permute.xlu0 %v626_v28  ;;  %v627_v45 = vmov 683565275   ;;  %s647_s11 = smov 4  }
   0x8   :  { %522 = vmatpush3.bf16.msra.mxu0 %v521_v7  ;;  %v530_v16 = vpack.c.bf16 %v34_v15, %v33_v14  ;;  %v36_v18 = vld [vmem:[%s827_s1 + $0x58] sm:$0xff]  ;;  %v37_v20 = vld [vmem:[%s827_s1 + $0x60] sm:$0xff]  ;;  %v38_v21 = vld [vmem:[%s827_s1 + $0x68] sm:$0xff]  ;;  %v628_v47 = vmov 2475754826   ;;  %s649_s12 = smov 8  }
   0x9   :  { %523 = vmatprep.subr.bf16.mxu0 %v622_v3  ;;  %v533_v19 = vpack.c.bf16 %v36_v18, %v35_v17  ;;  %v536_v22 = vpack.c.bf16 %v38_v21, %v37_v20  ;;  %v39_v23 = vld [vmem:[%s827_s1 + $0x70] sm:$0xff]  ;;  %v40_v24 = vld [vmem:[%s827_s1 + $0x78] sm:$0xff]  ;;  %v24_v26 = vld [vmem:[%s826_s0] sm:$0xff]  ;;  %v629_v50 = vmov 2131351028   ;;  %s650_s15 = smov [#allocation2]  }
   0xa   :  { %v539_v25 = vpack.c.bf16 %v40_v24, %v39_v23  ;;  %v447_v29 = vld [vmem:[%s828_s2] ss:$0 sm:$0xff]  ;;  %v630_v53 = vmov 2102212464   ;;  %v631_v56 = vmov 920167782  }
   0xb   :  { %v448_v31 = vld [vmem:[%s829_s3] ss:$0 sm:$0xff]  ;;  %v632_v59 = vmov 1326507024   ;;  %s439_s16 = sshll.u32 %s650_s15, 4  ;;  %s440_s16 = int_to_ptr.vmem [resolvable:$true] %s439_s16 }
   0xc   :  { %525 = vmatpush3.bf16.msra.mxu0 %v524_v10  ;;  %s598_s17 = scalar_lea.vmem %s440_s16, 128  ;;  %p603_p1 = scmp.lt.s32.totalorder %s440_s16, %s440_s16 }
   0xd   :  { %526 = vmatprep.subr.bf16.mxu0 %v622_v3  ;;  %p599_p0 = scmp.ne.s32.totalorder %s440_s16, %s598_s17  ;;  %p604_p2 = scmp.lt.s32.totalorder %s598_s17, %s598_s17 }
   0xf   :  { %p605_p3 = por %p604_p2, %p603_p1 }
  0x10   :  { %528 = vmatpush3.bf16.msra.mxu0 %v527_v13 }
  0x11   :  { %529 = vmatprep.subr.bf16.mxu0 %v622_v3  ;;  %p606_p4 = pnand %p605_p3, %p599_p0 }
  0x14   :  { %531 = vmatpush3.bf16.msra.mxu0 %v530_v16 }
  0x15   :  { %532 = vmatprep.subr.bf16.mxu0 %v622_v3 }
  0x18   :  { %534 = vmatpush3.bf16.msra.mxu0 %v533_v19 }
  0x19   :  { %535 = vmatprep.subr.bf16.mxu0 %v622_v3 }
  0x1c   :  { %537 = vmatpush3.bf16.msra.mxu0 %v536_v22 }
  0x1d   :  { %538 = vmatprep.subr.bf16.mxu0 %v622_v3 }
  0x20   :  { %540 = vmatpush3.bf16.msra.mxu0 %v539_v25 }
  0x23   :  { %508 = vmatmul.mubr.f32.vlgmr.msra.gmra.mrb[0].mxu0 %v24_v26 }
  0xf6   :  { %v114_v30 = vpop.f32.mrb[0].mxu0 }
  0xf7   :  { %v115_v32 = vadd.f32 %v447_v29, %v114_v30  ;;  %v509_v33 = vpop.f32.mrb[1].mxu0 }
  0xf9   :  { %v743_v34 = vadd.f32 %v448_v31, %v115_v32 }
  0xfb   :  { %v129_v35 = vand.u32 2139095040, %v743_v34  ;;  %v126_v39 = vand.u32 2147483647, %v743_v34  ;;  %vm128_vm8 = vcmp.lt.s32.totalorder %v743_v34, 0  ;;  %vm218_vm13 = vweird.f32 %v743_v34 }
  0xfd   :  { %v130_v36 = vshrl.u32 %v129_v35, 23  ;;  %v133_v42 = vand.u32 8388607, %v126_v39  ;;  %vm127_vm9 = vcmp.le.f32.partialorder %v126_v39, 0.7853982 }
  0xff   :  { %v449_v37 = vadd.s32 4294967169, %v130_v36  ;;  %v134_v61 = vor.u32 8388608, %v133_v42 }
 0x101   :  { %v136_v38 = vadd.s32 1, %v449_v37  ;;  %v174_v11 = vshll.u32 %v134_v61, 8 }
 0x103   :  { %vm137_vm1 = vcmp.gt.s32.totalorder %v136_v38, 0 }
 0x104   :  { %v138_v40 = vsel %vm137_vm1, %v136_v38, 0 }
 0x105   :  { %v140_v41 = vand.u32 31, %v138_v40  ;;  %v139_v44 = vshrl.u32 %v138_v40, 5 }
 0x107   :  { %v141_v43 = vsub.s32 32, %v140_v41  ;;  %v143_v46 = vshll.u32 %v627_v45, %v140_v41  ;;  %v146_v48 = vshll.u32 %v628_v47, %v140_v41  ;;  %v149_v52 = vshll.u32 %v629_v50, %v140_v41 }
 0x108   :  { %v152_v55 = vshll.u32 %v630_v53, %v140_v41  ;;  %v155_v58 = vshll.u32 %v631_v56, %v140_v41  ;;  %vm158_vm2 = vcmp.lt.s32.totalorder %v139_v44, 1  ;;  %vm161_vm3 = vcmp.lt.s32.totalorder %v139_v44, 4 }
 0x109   :  { %v144_v49 = vshrl.u32 %v628_v47, %v141_v43  ;;  %v147_v51 = vshrl.u32 %v629_v50, %v141_v43  ;;  %v150_v54 = vshrl.u32 %v630_v53, %v141_v43  ;;  %v153_v57 = vshrl.u32 %v631_v56, %v141_v43 }
 0x10a   :  { %v156_v60 = vshrl.u32 %v632_v59, %v141_v43  ;;  %v142_v6 = vshrl.u32 %v627_v45, %v141_v43  ;;  %vm160_vm4 = vcmp.lt.s32.totalorder %v139_v44, 3  ;;  %vm159_vm5 = vcmp.lt.s32.totalorder %v139_v44, 2 }
 0x10b   :  { %v145_v62 = vor.u32 %v144_v49, %v143_v46  ;;  %v148_v63 = vor.u32 %v147_v51, %v146_v48  ;;  %v151_v0 = vor.u32 %v150_v54, %v149_v52  ;;  %v154_v1 = vor.u32 %v153_v57, %v152_v55 }
 0x10c   :  { %v157_v2 = vor.u32 %v156_v60, %v155_v58 }
 0x10d   :  { %v163_v3 = vsel %vm161_vm3, %v151_v0, 2102212464  ;;  %v166_v4 = vsel %vm158_vm2, %v145_v62, %v148_v63  ;;  %v170_v5 = vsel %vm158_vm2, %v148_v63, %v151_v0  ;;  %v167_v7 = vsel %vm161_vm3, %v154_v1, 920167782 }
 0x10e   :  { %v171_v8 = vsel %vm161_vm3, %v157_v2, 1326507024  ;;  %v168_v9 = vsel %vm160_vm4, %v151_v0, %v167_v7  ;;  %v162_v12 = vsel %vm158_vm2, %v142_v6, %v145_v62  ;;  %v164_v13 = vsel %vm160_vm4, %v148_v63, %v163_v3 }
 0x10f   :  { %v172_v10 = vsel %vm160_vm4, %v154_v1, %v171_v8  ;;  %v169_v14 = vsel %vm159_vm5, %v166_v4, %v168_v9  ;;  %v165_v20 = vsel %vm159_vm5, %v162_v12, %v164_v13  ;;  %v633_v62 = vmov 9  }
 0x110   :  { %v173_v15 = vsel %vm159_vm5, %v170_v5, %v172_v10  ;;  %v752_v18 = vmul.u32.u64.low %v174_v11, %v169_v14  ;;  %v753_v19 = vmul.u32.u64.high %v174_v11, %v169_v14, %v752_v18  ;;  %v181_v22 = vmul.u32 %v174_v11, %v165_v20 }
 0x111   :  { %v749_v16 = vmul.u32.u64.low %v174_v11, %v173_v15  ;;  %v750_v17 = vmul.u32.u64.high %v174_v11, %v173_v15, %v749_v16  ;;  %v634_v63 = vmov 5   ;;  %v635_v0 = vmov 6  }
 0x112   :  { %v184_v21 = vadd.s32 1, %v753_v19  ;;  %v636_v1 = vmov 12   ;;  %v637_v2 = vmov 13   ;;  %v638_v3 = vmov 7  }
 0x113   :  { %vm183_vm6 = vc.u32 %v750_v17, %v752_v18  ;;  %v182_v35 = vadd.s32 %v752_v18, %v750_v17  ;;  %v640_v4 = vmov 15   ;;  %v641_v5 = vmov 14  }
 0x114   :  { %v185_v23 = vsel %vm183_vm6, %v184_v21, %v753_v19  ;;  %v642_v6 = vmov 2   ;;  %v643_v7 = vmov 11   ;;  %v644_v8 = vmov 0  }
 0x115   :  { %v186_v24 = vadd.s32 %v185_v23, %v181_v22  ;;  %v645_v9 = vmov 1   ;;  %v646_v10 = vmov 3   ;;  %v229_v11 = vlaneseq }
 0x116   :  { %vm343_vm5 = vcmask 31744   ;;  %vm345_vm6 = vcmask 64512  }
 0x117   :  { %v187_v25 = vadd.s32 536870912, %v186_v24  ;;  %v230_v14 = vand.u32 127, %v229_v11 }
 0x119   :  { %v188_v26 = vshrl.u32 %v187_v25, 30  ;;  %vm238_vm14 = vcmp.eq.s32.totalorder %v230_v14, 0  ;;  %vm231_vm15 = vcmp.ge.s32.totalorder %v230_v14, 1  ;;  %vm246_vm0 = vcmp.ge.s32.totalorder %v230_v14, 2 }
 0x11a   :  { %vm765_vm1 = vmor %vm231_vm15, %vm238_vm14  ;;  %vm254_vm3 = vcmp.ge.s32.totalorder %v230_v14, 3 }
 0x11b   :  { %v189_v27 = vshll.u32 %v188_v26, 30  ;;  %v212_v50 = vsub.s32 4, %v188_v26  ;;  %vm769_vm2 = vmor %vm246_vm0, %vm238_vm14 }
 0x11c   :  { %vm778_vm4 = vmor %vm254_vm3, %vm238_vm14 }
 0x11d   :  { %v190_v28 = vsub.s32 %v186_v24, %v189_v27  ;;  %v213_v52 = vsel %vm128_vm8, %v212_v50, %v188_v26 }
 0x11e   :  { %v215_v53 = vsel %vm127_vm9, 0, %v213_v52 }
 0x11f   :  { %v192_v29 = vsub.s32 0, %v190_v28  ;;  %v219_v54 = vand.u32 3, %v215_v53 }
 0x121   :  { %v450_v30 = vmin.u32 %v192_v29, %v190_v28  ;;  %vm224_vm10 = vcmp.eq.s32.totalorder %v219_v54, 2  ;;  %vm221_vm11 = vcmp.eq.s32.totalorder %v219_v54, 0  ;;  %vm220_vm12 = vcmp.lt.s32.totalorder %v219_v54, 2 }
 0x123   :  { %v194_v31 = vclz %v450_v30 }
 0x125   :  { %v451_v32 = vadd.s32 4294967294, %v194_v31  ;;  %v349_v31 = vld [vmem:[%s830_s4] sm:$0xff] }
 0x127   :  { %vm452_vm7 = vcmp.lt.s32.totalorder %v451_v32, 0 }
 0x128   :  { %v197_v33 = vsel %vm452_vm7, 0, %v451_v32  ;;  %v350_v32 = vld [vmem:[%s830_s4 + $0x8] sm:$0xff]  ;;  %s648_s4 = smov 12   ;;  %vm347_vm7 = vcmask 97280  }
 0x129   :  { %v198_v36 = vsub.s32 32, %v197_v33  ;;  %v202_v37 = vsub.s32 4294967266, %v197_v33  ;;  %v199_v38 = vshll.u32 %v190_v28, %v197_v33  ;;  %v542_v33 = vpack.c.bf16 %v350_v32, %v349_v31 }
 0x12b   :  { %v200_v40 = vshrl.u32 %v182_v35, %v198_v36  ;;  %v203_v41 = vadd.s32 127, %v202_v37  ;;  %543 = vmatpush3.bf16.msra.mxu1 %v542_v33 }
 0x12d   :  { %v201_v42 = vor.u32 %v200_v40, %v199_v38  ;;  %v204_v43 = vshll.u32 %v203_v41, 23 }
 0x12f   :  { %v205_v44 = vor.u32 4788187, %v204_v43  ;;  %v208_v46 = vcvt.s32.f32 %v201_v42 }
 0x131   :  { %v206_v45 = vand.u32 2147483647, %v205_v44 }
 0x133   :  { %v209_v47 = vmul.f32 %v208_v46, %v206_v45 }
 0x135   :  { %v210_v48 = vxor.u32 2147483648, %v209_v47 }
 0x137   :  { %v211_v49 = vsel %vm128_vm8, %v210_v48, %v209_v47  ;;  %vm358_vm8 = vcmask 130048  }
 0x138   :  { %v214_v51 = vsel %vm127_vm9, %v743_v34, %v211_v49  ;;  %v639_v34 = vmov 10  }
 0x139   :  { %594 = vcosq.f32 %v214_v51 }
 0x13a   :  { %596 = vsinq.f32 %v214_v51 }
 0x143   :  { %v595_v55 = vpop.eup %594 }
 0x144   :  { %v597_v56 = vpop.eup %596  ;;  %v225_v57 = vxor.u32 2147483648, %v595_v55 }
 0x145   :  { %v222_v58 = vxor.u32 2147483648, %v597_v56 }
 0x146   :  { %v226_v59 = vsel %vm224_vm10, %v225_v57, %v597_v56 }
 0x147   :  { %v223_v60 = vsel %vm221_vm11, %v595_v55, %v222_v58 }
 0x148   :  { %v227_v39 = vsel %vm220_vm12, %v223_v60, %v226_v59 }
 0x149   :  { %v228_v61 = vsel %vm218_vm13, nan, %v227_v39 }
 0x14a   :  { %286 = vperm.xlu1 %579, %v228_v61   ;;  %263 = vperm.xlu0 %577, %v228_v61  }
 0x14e   :  { %580 = vset.pattern.permute.xlu1 %v633_v62  ;;  %578 = vset.pattern.permute.xlu0 %v634_v63 }
 0x14f   :  { %291 = vperm.xlu1 %580, %v228_v61   ;;  %268 = vperm.xlu0 %578, %v228_v61  }
 0x153   :  { %581 = vset.pattern.permute.xlu1 %v635_v0  ;;  %582 = vset.pattern.permute.xlu0 %v636_v1 }
 0x154   :  { %274 = vperm.xlu1 %581, %v228_v61   ;;  %309 = vperm.xlu0 %582, %v228_v61  }
 0x158   :  { %583 = vset.pattern.permute.xlu1 %v637_v2  ;;  %585 = vset.pattern.permute.xlu0 %v638_v3 }
 0x159   :  { %314 = vperm.xlu1 %583, %v228_v61   ;;  %280 = vperm.xlu0 %585, %v228_v61  }
 0x15d   :  { %584 = vset.pattern.permute.xlu1 %v639_v34  ;;  %588 = vset.pattern.permute.xlu0 %v640_v4 }
 0x15e   :  { %297 = vperm.xlu1 %584, %v228_v61   ;;  %326 = vperm.xlu0 %588, %v228_v61  }
 0x162   :  { %586 = vset.pattern.permute.xlu1 %v641_v5  ;;  %591 = vset.pattern.permute.xlu0 %v642_v6  ;;  %v453_v5 = vld [vmem:[%s831_s5] ss:$0 sm:$0xff] }
 0x163   :  { %320 = vperm.xlu1 %586, %v228_v61   ;;  %249 = vperm.xlu0 %591, %v228_v61  }
 0x167   :  { %587 = vset.pattern.permute.xlu1 %v643_v7  ;;  %593 = vset.pattern.permute.xlu0 %v640_v4 }
 0x168   :  { %303 = vperm.xlu1 %587, %v228_v61  }
 0x16c   :  { %589 = vset.pattern.permute.xlu1 %v644_v8 }
 0x16d   :  { %234 = vperm.xlu1 %589, %v228_v61  }
 0x171   :  { %590 = vset.pattern.permute.xlu1 %v645_v9 }
 0x172   :  { %241 = vperm.xlu1 %590, %v228_v61  }
 0x176   :  { %592 = vset.pattern.permute.xlu1 %v646_v10 }
 0x177   :  { %257 = vperm.xlu1 %592, %v228_v61  }
 0x1c9   :  { %v287_v12 = vpop.permute.xlu1 %286  ;;  %v264_v13 = vpop.permute.xlu0 %263 }
 0x1ca   :  { %v266_v22 = vsel %vm231_vm15, %v264_v13, 1.0  ;;  %v289_v44 = vsel %vm231_vm15, %v287_v12, 1.0 }
 0x1ce   :  { %v292_v15 = vpop.permute.xlu1 %291  ;;  %v269_v16 = vpop.permute.xlu0 %268 }
 0x1cf   :  { %v271_v19 = vsel %vm765_vm1, %v269_v16, 1.0  ;;  %v294_v38 = vsel %vm765_vm1, %v292_v15, 1.0 }
 0x1d0   :  { %v272_v24 = vmul.f32 %v271_v19, %v266_v22  ;;  %v295_v47 = vmul.f32 %v294_v38, %v289_v44 }
 0x1d3   :  { %v275_v20 = vpop.permute.xlu1 %274  ;;  %v310_v21 = vpop.permute.xlu0 %309 }
 0x1d4   :  { %v277_v23 = vsel %vm769_vm2, %v275_v20, 1.0  ;;  %v312_v37 = vsel %vm231_vm15, %v310_v21, 1.0 }
 0x1d5   :  { %v278_v26 = vmul.f32 %v277_v23, %v272_v24 }
 0x1d8   :  { %v315_v27 = vpop.permute.xlu1 %314  ;;  %v281_v28 = vpop.permute.xlu0 %280 }
 0x1d9   :  { %v283_v29 = vsel %vm778_vm4, %v281_v28, 1.0  ;;  %v317_v36 = vsel %vm765_vm1, %v315_v27, 1.0 }
 0x1da   :  { %v284_v30 = vmul.f32 %v283_v29, %v278_v26  ;;  %v318_v40 = vmul.f32 %v317_v36, %v312_v37 }
 0x1dc   :  { %332 = vrot.lane.b32.xlu1 %v284_v30, %s647_s11 }
 0x1dd   :  { %v298_v35 = vpop.permute.xlu1 %297  ;;  %v327_v41 = vpop.permute.xlu0 %326 }
 0x1de   :  { %v300_v45 = vsel %vm769_vm2, %v298_v35, 1.0  ;;  %v329_v48 = vsel %vm778_vm4, %v327_v41, 1.0 }
 0x1df   :  { %v301_v50 = vmul.f32 %v300_v45, %v295_v47 }
 0x1e2   :  { %v321_v42 = vpop.permute.xlu1 %320  ;;  %v250_v55 = vpop.permute.xlu0 %249 }
 0x1e3   :  { %v323_v43 = vsel %vm769_vm2, %v321_v42, 1.0  ;;  %v252_v60 = vsel %vm769_vm2, %v250_v55, 1.0 }
 0x1e4   :  { %v324_v46 = vmul.f32 %v323_v43, %v318_v40 }
 0x1e6   :  { %v330_v49 = vmul.f32 %v329_v48, %v324_v46 }
 0x1e7   :  { %v304_v51 = vpop.permute.xlu1 %303 }
 0x1e8   :  { %v306_v52 = vsel %vm778_vm4, %v304_v51, 1.0  ;;  %340 = vrot.lane.b32.xlu1 %v330_v49, %s648_s4 }
 0x1e9   :  { %v307_v53 = vmul.f32 %v306_v52, %v301_v50 }
 0x1eb   :  { %336 = vrot.lane.b32.xlu0 %v307_v53, %s649_s12 }
 0x1ec   :  { %v235_v54 = vpop.permute.xlu1 %234 }
 0x1ed   :  { %v237_v57 = vsel %vm231_vm15, %v235_v54, 1.0 }
 0x1f1   :  { %v242_v56 = vpop.permute.xlu1 %241 }
 0x1f2   :  { %v244_v58 = vsel %vm765_vm1, %v242_v56, 1.0 }
 0x1f3   :  { %v245_v59 = vmul.f32 %v244_v58, %v237_v57 }
 0x1f5   :  { %v253_v39 = vmul.f32 %v252_v60, %v245_v59 }
 0x1f6   :  { %v258_v61 = vpop.permute.xlu1 %257 }
 0x1f7   :  { %v260_v62 = vsel %vm778_vm4, %v258_v61, 1.0 }
 0x1f8   :  { %v261_v63 = vmul.f32 %v260_v62, %v253_v39 }
 0x24e   :  { %v333_v0 = vpop.permute.xlu1 %332 }
 0x24f   :  { %v344_v1 = vsel %vm343_vm5, %v261_v63, %v333_v0 }
 0x25a   :  { %v341_v3 = vpop.permute.xlu1 %340 }
 0x25d   :  { %v337_v2 = vpop.permute.xlu0 %336 }
 0x25e   :  { %v346_v34 = vsel %vm345_vm6, %v344_v1, %v337_v2 }
 0x25f   :  { %v348_v4 = vsel %vm347_vm7, %v346_v34, %v341_v3 }
 0x260   :  { %515 = vmatmul.mubr.msk.f32.vlgmr.msra.gmra.mrb[0].mxu1 %vm358_vm8, %v348_v4 }
 0x333   :  { %v428_v6 = vpop.f32.mrb[0].mxu1 }
 0x334   :  { %v429_v7 = vadd.f32 %v453_v5, %v428_v6  ;;  %v516_v8 = vpop.f32.mrb[1].mxu1 }
 0x336   :  { %432 = vst [vmem:[#allocation2] sm:$0xff] %v429_v7 }
 0x337   :  { %609 = shalt.err (!%p606_p4)
}
 0x338   :  { %s610_s20 = scalar_lea.hbm %s832_s6, 128 }
 0x339   :  { %p611_p5 = scmp.ne.s32.totalorder %s832_s6, %s610_s20  ;;  %p614_p6 = scmp.lt.u32.totalorder %s610_s20, %s832_s6 }
 0x33b   :  { %p616_p7 = pnand %p614_p6, %p611_p5 }
 0x33d   :  { %619 = shalt.err (!%p616_p7)
}
 0x33e   :  { %442 = dma.vmem_to_hbm [thread:$0]  %s440_s16, 128, %s832_s6, [#allocation3]  }
 0x33f   :  { %620 = dma.done.wait [#allocation3], 128  }
 0x340   :  { %621 = vsyncadd [#allocation3], 4294967168 }
 0x341   :  { %446 = vsyncpa [#allocation3], 1 }

</bundles_post_ra>
